<compile_context>
chip_gen: v6e
topology: v6e:2x2x1
jax: 0.10.0
libtpu: 0.0.40
codegen_flags: <defaults>
</compile_context>

<pallas_src>
import functools

import jax
import jax.numpy as jnp
from jax import lax
from jax.experimental import pallas as pl
from jax.experimental.pallas import tpu as pltpu

LANE = 128  # classifier output is stored lane-dense (128 wide), sliced outside


# ----------------------------------------------------------------------------
# pltpu.roll direction probe (one tiny kernel, cached) + grid-step heuristic
# ----------------------------------------------------------------------------
_ROLL_MATCHES_JNP = None


def _roll_matches_jnp():
    """True iff pltpu.roll(x, s, 0) == jnp.roll(x, s, 0) on this backend."""
    global _ROLL_MATCHES_JNP
    if _ROLL_MATCHES_JNP is None:
        def probe(x_ref, o_ref):
            o_ref[...] = pltpu.roll(x_ref[...], 1, 0)

        x = jnp.broadcast_to(jnp.arange(8, dtype=jnp.float32)[:, None],
                             (8, LANE))
        y = pl.pallas_call(
            probe, out_shape=jax.ShapeDtypeStruct((8, LANE), jnp.float32))(x)
        _ROLL_MATCHES_JNP = bool(jnp.array_equal(y, jnp.roll(x, 1, axis=0)))
    return _ROLL_MATCHES_JNP


def _default_grid_steps(batch):
    """1 grid step (whole batch in M) on single-TC chips; 2 on megacore v7x."""
    try:
        kind = jax.devices()[0].device_kind.lower()
    except Exception:
        kind = ""
    return 2 if ("v7" in kind and batch % 2 == 0) else 1


# ----------------------------------------------------------------------------
# In-kernel building blocks
# ----------------------------------------------------------------------------
def _roll_conv(a, masks, w_ref, b_ref, shifts, patch_ref,
               residual=None, relu=True):
    """3x3 conv on a row-major-flattened (N, cin) f32 activation.

    Per tap: one XLU sublane roll (row/col offset folded into the static
    shift) and a VPU boundary mask.  The 9 masked taps are packed side by
    side into the bf16 patch scratch and contracted against the folded-BN
    (9*cin, cout) weight in a single MXU matmul (K = 144 / 288).  Accum /
    bias / residual / ReLU stay in f32.
    """
    n_rows, cin = a.shape
    for t, s in enumerate(shifts):
        rolled = pltpu.roll(a, s, 0) if s else a
        patch_ref[:, t * cin:(t + 1) * cin] = (
            rolled * masks[:, t:t + 1]).astype(jnp.bfloat16)
    y = jnp.dot(patch_ref[:, :9 * cin], w_ref[...],
                preferred_element_type=jnp.float32) + b_ref[...]
    if residual is not None:
        y = y + residual
    return jnp.maximum(y, 0.0) if relu else y


def _stem_conv(x, masks, ws_ref, bsb_ref, shifts):
    """3x3 stem on the 1-channel input: cin = 1, so 9 rank-1 VPU FMAs
    (an MXU matmul would waste the contraction dimension)."""
    w = ws_ref[...].astype(jnp.float32)                      # (9, c1)
    acc = jnp.zeros((x.shape[0], w.shape[1]), jnp.float32)
    for t, s in enumerate(shifts):
        rolled = pltpu.roll(x, s, 0) if s else x
        acc = acc + (rolled * masks[:, t:t + 1]) * w[t:t + 1, :]
    return jnp.maximum(acc + bsb_ref[...], 0.0)


# ----------------------------------------------------------------------------
# The fused kernel: stem + 2 BasicBlocks + masked GAP + classifier
# ----------------------------------------------------------------------------
def _classifier_head_kernel(x_ref, m1_ref, m2_ref, pool_ref,
                            ws_ref, bsb_ref,
                            w11_ref, b11_ref, w12_ref, b12_ref,
                            wd_ref, bd_ref,
                            w21_ref, b21_ref, w22_ref, b22_ref,
                            wc_ref, bc_ref,
                            o_ref, patch_ref, *, s1_shifts, d2_shifts):
    m1 = m1_ref[...]                       # (N, 9) stride-1 boundary masks
    m2 = m2_ref[...]                       # (N, 9) dilation-2 boundary masks
    x = x_ref[...].astype(jnp.bfloat16).astype(jnp.float32)   # (N, 1)

    # ---- frozen backbone: all activations stay in VMEM / vregs --------------
    a1 = _stem_conv(x, m1, ws_ref, bsb_ref, s1_shifts)                 # (N, c1)

    # BasicBlock 1 (stride 1)
    y = _roll_conv(a1, m1, w11_ref, b11_ref, s1_shifts, patch_ref)
    a2 = _roll_conv(y, m1, w12_ref, b12_ref, s1_shifts, patch_ref,
                    residual=a1)                                       # (N, c1)

    # BasicBlock 2 (stride 2), evaluated on the full-resolution grid: the
    # stride-2 conv equals the stride-1 conv at the even sites and its
    # follower becomes a dilation-2 conv, so the decimation never has to be
    # materialised -- it is folded into the masked global-average-pool below.
    skip = jnp.dot(a2.astype(jnp.bfloat16), wd_ref[...],
                   preferred_element_type=jnp.float32) + bd_ref[...]   # (N, c2)
    y = _roll_conv(a2, m1, w21_ref, b21_ref, s1_shifts, patch_ref)     # (N, c2)
    a3 = _roll_conv(y, m2, w22_ref, b22_ref, d2_shifts, patch_ref,
                    residual=skip)                                     # (N, c2)

    # ---- masked GAP (even sites / n2) + linear classifier (kept f32) --------
    feat = jnp.dot(pool_ref[...], a3, preferred_element_type=jnp.float32)
    o_ref[0] = jnp.dot(feat, wc_ref[...],
                       preferred_element_type=jnp.float32) + bc_ref[...]


# ----------------------------------------------------------------------------
# Host-side prep (frozen weights / constants: done once, cheap)
# ----------------------------------------------------------------------------
def _fold_bn(w, bn):
    """Fold the frozen BatchNorm into the conv weight (bf16) and a f32 bias."""
    gamma, beta, mean, var = bn
    scale = gamma / jnp.sqrt(var + 1e-5)
    bias = (beta - mean * scale).reshape(1, -1).astype(jnp.float32)
    return (w * scale).astype(jnp.bfloat16), bias


def _tap_masks(H, W, reps, dil):
    """(reps*H*W, 9) f32 per-tap validity masks for a 3x3 conv with the given
    tap dilation on the flattened grid.  Zero-padding boundaries AND roll
    wrap-around across the stacked images are both zeroed by these masks."""
    idx = jnp.arange(H * W)
    h, w = idx // W, idx % W
    cols = []
    for di in (-1, 0, 1):
        for dj in (-1, 0, 1):
            valid = ((h + dil * di >= 0) & (h + dil * di < H) &
                     (w + dil * dj >= 0) & (w + dil * dj < W))
            cols.append(valid)
    m = jnp.stack(cols, axis=1).astype(jnp.float32)            # (H*W, 9)
    return jnp.tile(m, (reps, 1))


def _pool_matrix(H, W, reps):
    """(reps, reps*H*W) matrix: per-image mean over the even (stride-2) sites,
    i.e. the stride-2 decimation folded into the global-average-pool."""
    idx = jnp.arange(H * W)
    h, w = idx // W, idx % W
    even = ((h % 2 == 0) & (w % 2 == 0)).astype(jnp.float32)
    even = even / ((H // 2) * (W // 2))
    p = jnp.zeros((reps, reps * H * W), jnp.float32)
    for b in range(reps):
        p = p.at[b, b * H * W:(b + 1) * H * W].set(even)
    return p


# ----------------------------------------------------------------------------
# Forward pass wrapper
# ----------------------------------------------------------------------------
def classifier_head_forward(x, params, grid_steps=None):
    """x: (B, H, W) float32 -> logits (B, out_dim).  Whole forward = 1 kernel."""
    B, H, W = x.shape
    out_dim, c2 = params["cls_w"].shape
    c1 = params["stem_w"].shape[-1]
    assert out_dim <= LANE, "classifier head wider than the 128-lane output slab"
    assert H % 2 == 0 and W % 2 == 0, "stride-2 block expects even H, W"

    if grid_steps is None:
        grid_steps = _default_grid_steps(B)
    assert B % grid_steps == 0
    bs = B // grid_steps          # images stacked along M per grid step
    hw = H * W
    n = bs * hw                   # activation rows per grid step
    assert n % 8 == 0, "bs*H*W must be sublane-aligned"

    # frozen backbone parameters: fold BN into bf16 conv weights + f32 biases
    ws, bsb = _fold_bn(params["stem_w"], params["stem_bn"])
    w11, b11 = _fold_bn(params["block1"]["w1"], params["block1"]["bn1"])
    w12, b12 = _fold_bn(params["block1"]["w2"], params["block1"]["bn2"])
    w21, b21 = _fold_bn(params["block2"]["w1"], params["block2"]["bn1"])
    w22, b22 = _fold_bn(params["block2"]["w2"], params["block2"]["bn2"])
    wd, bd = _fold_bn(params["block2"]["down_w"], params["block2"]["down_bn"])

    # static roll shifts (sign matched to the probed pltpu.roll convention)
    sign = -1 if _roll_matches_jnp() else 1

    def tap_shifts(dil):
        return tuple((sign * dil * (di * W + dj)) % n
                     for di in (-1, 0, 1) for dj in (-1, 0, 1))

    s1_shifts, d2_shifts = tap_shifts(1), tap_shifts(2)

    # boundary masks + decimating pool matrix (tiny constants, ~80 KB total)
    m1 = _tap_masks(H, W, bs, 1)
    m2 = _tap_masks(H, W, bs, 2)
    pool = _pool_matrix(H, W, bs)

    # classifier packed into a lane-dense 128-wide slab (kept f32)
    wc = jnp.zeros((c2, LANE), jnp.float32).at[:, :out_dim].set(params["cls_w"].T)
    bc = jnp.zeros((1, LANE), jnp.float32).at[:, :out_dim].set(params["cls_b"])

    operands = [
        x.reshape(B * hw, 1),                   # gridded input, one col wide
        m1, m2, pool,
        ws.reshape(9, c1), bsb,
        w11.reshape(9 * c1, c1), b11,
        w12.reshape(9 * c1, c1), b12,
        wd.reshape(c1, c2), bd,
        w21.reshape(9 * c1, c2), b21,
        w22.reshape(9 * c2, c2), b22,
        wc, bc,
    ]

    def _const_spec(arr):
        zeros = (0,) * arr.ndim
        return pl.BlockSpec(arr.shape, lambda i, z=zeros: z)

    in_specs = ([pl.BlockSpec((n, 1), lambda i: (i, 0))]
                + [_const_spec(op) for op in operands[1:]])
    out_specs = pl.BlockSpec((1, bs, LANE), lambda i: (i, 0, 0))

    # advisory cost estimate (re-derived for the roll-based design)
    macs = B * hw * (9 * c1 + 18 * c1 * c1 + 9 * c1 * c2 + 9 * c2 * c2
                     + c1 * c2 + bs * c2) + B * c2 * LANE
    bytes_accessed = int(sum(op.size * op.dtype.itemsize for op in operands)
                         + B * LANE * 4)

    kernel = functools.partial(_classifier_head_kernel,
                               s1_shifts=s1_shifts, d2_shifts=d2_shifts)

    out = pl.pallas_call(
        kernel,
        out_shape=jax.ShapeDtypeStruct((grid_steps, bs, LANE), jnp.float32),
        grid=(grid_steps,),
        in_specs=in_specs,
        out_specs=out_specs,
        scratch_shapes=[pltpu.VMEM((n, 9 * c2), jnp.bfloat16)],  # patch slab
        compiler_params=pltpu.CompilerParams(
            dimension_semantics=("parallel",),   # shard steps over TCs on v7x
            vmem_limit_bytes=16 * 1024 * 1024,
        ),
        cost_estimate=pl.CostEstimate(flops=int(2 * macs), transcendentals=0,
                                      bytes_accessed=bytes_accessed),
    )(*operands)
    return out.reshape(B, LANE)[:, :out_dim]


# ----------------------------------------------------------------------------
# Pure-JAX reference (same numerics: folded BN, bf16 conv inputs, f32 accum)
# ----------------------------------------------------------------------------
def _reference_forward(x, params):
    def conv(a, w, bn, stride, pad, relu, residual=None):
        gamma, beta, mean, var = bn
        scale = gamma / jnp.sqrt(var + 1e-5)
        bias = beta - mean * scale
        wf = (w * scale).astype(jnp.bfloat16).astype(jnp.float32)
        a = a.astype(jnp.bfloat16).astype(jnp.float32)
        y = lax.conv_general_dilated(
            a, wf, (stride, stride), [(pad, pad), (pad, pad)],
            dimension_numbers=("NHWC", "HWIO", "NHWC"))
        y = y + bias
        if residual is not None:
            y = y + residual
        return jnp.maximum(y, 0.0) if relu else y

    a = x[:, :, :, None]                                      # (B, H, W, 1)
    a1 = conv(a, params["stem_w"], params["stem_bn"], 1, 1, True)
    y = conv(a1, params["block1"]["w1"], params["block1"]["bn1"], 1, 1, True)
    a2 = conv(y, params["block1"]["w2"], params["block1"]["bn2"], 1, 1, True,
              residual=a1)
    skip = conv(a2, params["block2"]["down_w"], params["block2"]["down_bn"],
                2, 0, False)
    y = conv(a2, params["block2"]["w1"], params["block2"]["bn1"], 2, 1, True)
    a3 = conv(y, params["block2"]["w2"], params["block2"]["bn2"], 1, 1, True,
              residual=skip)
    feats = a3.mean(axis=(1, 2))
    return feats @ params["cls_w"].T + params["cls_b"]


# ----------------------------------------------------------------------------
# Deterministic synthetic parameters (frozen backbone + classifier)
# ----------------------------------------------------------------------------
def init_params(key, out_dim=10, c1=16, c2=32):
    keys = jax.random.split(key, 16)

    def conv_w(k, kh, kw, cin, cout):
        fan_in = kh * kw * cin
        return (jax.random.normal(k, (kh, kw, cin, cout), jnp.float32)
                / jnp.sqrt(fan_in))

    def bn(k, c):
        k1, k2, k3, k4 = jax.random.split(k, 4)
        gamma = 1.0 + 0.1 * jax.random.normal(k1, (c,), jnp.float32)
        beta = 0.1 * jax.random.normal(k2, (c,), jnp.float32)
        mean = 0.1 * jax.random.normal(k3, (c,), jnp.float32)
        var = jax.random.uniform(k4, (c,), jnp.float32, 0.5, 1.5)
        return (gamma, beta, mean, var)

    return {
        "stem_w": conv_w(keys[0], 3, 3, 1, c1), "stem_bn": bn(keys[1], c1),
        "block1": {"w1": conv_w(keys[2], 3, 3, c1, c1), "bn1": bn(keys[3], c1),
                   "w2": conv_w(keys[4], 3, 3, c1, c1), "bn2": bn(keys[5], c1)},
        "block2": {"w1": conv_w(keys[6], 3, 3, c1, c2), "bn1": bn(keys[7], c2),
                   "w2": conv_w(keys[8], 3, 3, c2, c2), "bn2": bn(keys[9], c2),
                   "down_w": conv_w(keys[10], 1, 1, c1, c2),
                   "down_bn": bn(keys[11], c2)},
        "cls_w": 0.1 * jax.random.normal(keys[12], (out_dim, c2), jnp.float32),
        "cls_b": jnp.zeros((out_dim,), jnp.float32),
    }


if __name__ == "__main__":
    key = jax.random.PRNGKey(0)
    k_x, k_p = jax.random.split(key)

    B, H, W, OUT_DIM = 2, 16, 16, 10
    x = jax.random.normal(k_x, (B, H, W), jnp.float32)
    params = init_params(k_p, out_dim=OUT_DIM)

    _roll_matches_jnp()   # populate the roll-direction probe outside tracing

    logits = jax.block_until_ready(jax.jit(classifier_head_forward)(x, params))

    assert logits.shape == (B, OUT_DIM), logits.shape
    assert logits.dtype == jnp.float32
    assert bool(jnp.all(jnp.isfinite(logits)))

    # cross-check the fused kernel against a pure-JAX reference
    ref = jax.block_until_ready(jax.jit(_reference_forward)(x, params))
    err = float(jnp.max(jnp.abs(logits - ref)))
    assert err < 5e-2, err
    print("KERNEL_OK")
</pallas_src>

<mosaic_0001>
module attributes {stable_mosaic.version = 11 : i64} {
  func.func @probe(%arg0: memref<8x128xf32, #tpu.memory_space<vmem>>, %arg1: memref<8x128xf32, #tpu.memory_space<vmem>>) attributes {dimension_semantics = [], scalar_prefetch = 0 : i64, scratch_operands = 0 : i64, tpu.core_type = #tpu.core_type<tc>} {
    %c0 = arith.constant 0 : index
    %c0_0 = arith.constant 0 : index
    %0 = vector.load %arg0[%c0, %c0_0] : memref<8x128xf32, #tpu.memory_space<vmem>>, vector<8x128xf32>
    %c1_i32 = arith.constant 1 : i32
    %1 = tpu.dynamic_rotate %0 by %c1_i32 dim 0 : vector<8x128xf32>, i32 -> vector<8x128xf32>
    %c0_1 = arith.constant 0 : index
    %c0_2 = arith.constant 0 : index
    %2 = vector.load %arg1[%c0_1, %c0_2] : memref<8x128xf32, #tpu.memory_space<vmem>>, vector<8x128xf32>
    tpu.vector_store %arg1[%c0_1, %c0_2], %1 {strides = array<i32>} : memref<8x128xf32, #tpu.memory_space<vmem>>, vector<8x128xf32>,
    return
  }
}

</mosaic_0001>

<bundles_post_ra>
// kernel: tpu_custom_call.1
= control target key start
LH: loop header
LB: loop body
LE: loop exit
PB: predicated region body
PF: predicated region fallthrough
CT: control target
= control target key end

     0   :  { %6 = vsyncpa [#allocation3], 0  ;;  %s103_s0 = inlined_call_operand.hbm [shape: f32[8,128], index: 0, kind: input, shape index: {}]   ;;  %s104_s1 = inlined_call_operand.hbm [shape: f32[8,128], index: 1, kind: output, shape index: {}]  }
   0x1   :  { %7 = vsyncpa [#allocation4], 0  ;;  %s85_s6 = smov [#allocation2]  }
   0x2   :  { %s14_s7 = sshll.u32 %s85_s6, 4  ;;  %s15_s7 = int_to_ptr.vmem [resolvable:$true] %s14_s7 }
   0x3   :  { %s49_s8 = scalar_lea.vmem %s15_s7, 128  ;;  %p54_p1 = scmp.lt.s32.totalorder %s15_s7, %s15_s7 }
   0x4   :  { %p50_p0 = scmp.ne.s32.totalorder %s15_s7, %s49_s8  ;;  %p55_p2 = scmp.lt.s32.totalorder %s49_s8, %s49_s8 }
   0x6   :  { %p56_p3 = por %p55_p2, %p54_p1 }
   0x8   :  { %p57_p4 = pnand %p56_p3, %p50_p0 }
   0xa   :  { %60 = shalt.err (!%p57_p4)
}
   0xb   :  { %17 = dma.hbm_to_vmem [thread:$0]  %s103_s0, 128, %s15_s7, [#allocation3]  }
   0xc   :  { %81 = dma.done.wait [#allocation3], 128  }
   0xd   :  { %82 = vsyncadd [#allocation3], 4294967168  ;;  %s86_s11 = smov [#allocation5]   ;;  %v21_v0 = vld [vmem:[#allocation2] sm:$0xff] }
   0xe   :  { %s30_s12 = sshll.u32 %s86_s11, 4  ;;  %v22_v1 = vrot.slane %v21_v0, 7  ;;  %s31_s12 = int_to_ptr.vmem [resolvable:$true] %s30_s12 }
   0xf   :  { %s61_s13 = scalar_lea.vmem %s31_s12, 128  ;;  %p66_p6 = scmp.lt.s32.totalorder %s31_s12, %s31_s12 }
  0x10   :  { %23 = vst [vmem:[#allocation5] sm:$0xff] %v22_v1  ;;  %p62_p5 = scmp.ne.s32.totalorder %s31_s12, %s61_s13  ;;  %p67_p7 = scmp.lt.s32.totalorder %s61_s13, %s61_s13 }
  0x12   :  { %p68_p8 = por %p67_p7, %p66_p6 }
  0x14   :  { %p69_p9 = pnand %p68_p8, %p62_p5 }
  0x16   :  { %72 = shalt.err (!%p69_p9)
}
  0x17   :  { %33 = dma.vmem_to_hbm [thread:$0]  %s31_s12, 128, %s104_s1, [#allocation4]  }
  0x18   :  { %83 = dma.done.wait [#allocation4], 128  }
  0x19   :  { %84 = vsyncadd [#allocation4], 4294967168 }
  0x1a   :  { %37 = vsyncpa [#allocation3], 1 }
  0x1b   :  { %38 = vsyncpa [#allocation4], 1 }

</bundles_post_ra>
